<compile_context>
chip_gen: v7x
topology: tpu7x:2x2x1
jax: 0.10.0
libtpu: 0.0.40
codegen_flags: <defaults>
</compile_context>

<pallas_src>
import jax
import jax.numpy as jnp
from jax.experimental import pallas as pl
from jax.experimental.pallas import tpu as pltpu

H1 = 128
H2 = 256
MAX_TB = 512          # max batch-tile rows per grid step
SPLIT_MIN_ROWS = 256  # below this, a single tile beats the extra per-step overhead


def _cdiv(a, b):
    return -(-a // b)


def _round_up(n, m):
    return _cdiv(n, m) * m


def _choose_tb(batch):
    """Batch-tile rows: single tile for small batches, otherwise an even number
    of balanced tiles (<= MAX_TB) so v7x's two TensorCores both get work."""
    rb = _round_up(max(batch, 1), 8)
    if rb < SPLIT_MIN_ROWS:
        return min(rb, MAX_TB)
    k = 1
    while _round_up(_cdiv(rb, 2 * k), 8) > MAX_TB:
        k += 1
    return _round_up(_cdiv(rb, 2 * k), 8)


def actor_kernel(x_ref, w1_ref, b1_ref, w2_ref, b2_ref, w3_ref, b3_ref, o_ref):
    # Layer 1: Linear(state_dim -> 128) + ReLU   (MXU matmul, VPU max)
    h1 = jnp.dot(x_ref[...], w1_ref[...], preferred_element_type=jnp.float32)
    h1 = jnp.maximum(h1 + b1_ref[...], 0.0)

    # Layer 2: Linear(128 -> 256) + ReLU
    h2 = jnp.dot(h1, w2_ref[...], preferred_element_type=jnp.float32)
    h2 = jnp.maximum(h2 + b2_ref[...], 0.0)

    # Layer 3: Linear(256 -> action_dim), stored narrow (no lane padding).
    logits = jnp.dot(h2, w3_ref[...], preferred_element_type=jnp.float32)
    logits = logits + b3_ref[...]

    # Softmax over the action (last) dim — matches F.softmax(x) on a 2-D input.
    m = jnp.max(logits, axis=-1, keepdims=True)
    e = jnp.exp(logits - m)
    denom = jnp.sum(e, axis=-1, keepdims=True)
    # Exact reciprocal keeps the 1e-5 sum-to-1 / reference tolerance intact.
    o_ref[...] = e * pl.reciprocal(denom, approx=False)


def actor_forward(x, params):
    w1, b1, w2, b2, w3, b3 = params
    B, state_dim = x.shape
    action_dim = w3.shape[1]

    tb = _choose_tb(B)
    grid = (pl.cdiv(B, tb),)  # ragged last block: OOB reads padded, OOB writes dropped

    # Weights/biases: full-array blocks with a constant index_map -> DMA'd once
    # and kept resident in VMEM across all batch tiles.
    resident = lambda a: pl.BlockSpec(a.shape, lambda i: (0, 0))

    flops = 2 * B * (state_dim * H1 + H1 * H2 + H2 * action_dim)
    bytes_accessed = 4 * (
        B * state_dim + B * action_dim
        + state_dim * H1 + H1 + H1 * H2 + H2 + H2 * action_dim + action_dim)

    out = pl.pallas_call(
        actor_kernel,
        out_shape=jax.ShapeDtypeStruct((B, action_dim), jnp.float32),
        grid=grid,
        in_specs=[
            pl.BlockSpec((tb, state_dim), lambda i: (i, 0)),  # x: tiled on batch
            resident(w1), resident(b1),
            resident(w2), resident(b2),
            resident(w3), resident(b3),
        ],
        out_specs=pl.BlockSpec((tb, action_dim), lambda i: (i, 0)),
        compiler_params=pltpu.CompilerParams(
            dimension_semantics=("parallel",)),  # v7x dual-TC sharding; no-op v5e/v6e
        cost_estimate=pl.CostEstimate(
            flops=flops,
            transcendentals=B * action_dim,
            bytes_accessed=bytes_accessed),
    )(x, w1, b1, w2, b2, w3, b3)

    return out


def init_params(key, state_dim, action_dim):
    """Deterministic init mimicking nn.Linear's U(-1/sqrt(fan_in), 1/sqrt(fan_in))."""
    ks = jax.random.split(key, 6)

    def lin(kw, kb, fan_in, fan_out):
        bound = 1.0 / jnp.sqrt(jnp.float32(fan_in))
        w = jax.random.uniform(kw, (fan_in, fan_out), jnp.float32, -bound, bound)
        b = jax.random.uniform(kb, (1, fan_out), jnp.float32, -bound, bound)
        return w, b

    w1, b1 = lin(ks[0], ks[1], state_dim, H1)
    w2, b2 = lin(ks[2], ks[3], H1, H2)
    w3, b3 = lin(ks[4], ks[5], H2, action_dim)
    return (w1, b1, w2, b2, w3, b3)


def reference_forward(x, params):
    w1, b1, w2, b2, w3, b3 = params
    h1 = jnp.maximum(x @ w1 + b1, 0.0)
    h2 = jnp.maximum(h1 @ w2 + b2, 0.0)
    return jax.nn.softmax(h2 @ w3 + b3, axis=-1)


if __name__ == "__main__":
    state_dim, action_dim = 4, 6

    key = jax.random.PRNGKey(0)
    k_params, k_x1, k_x2 = jax.random.split(key, 3)
    params = init_params(k_params, state_dim, action_dim)

    # Small single-tile case (B=8), matches the original demo shape.
    x_small = jax.random.normal(k_x1, (8, state_dim), jnp.float32)
    out_small = jax.block_until_ready(actor_forward(x_small, params))
    ref_small = reference_forward(x_small, params)
    assert out_small.shape == (8, action_dim)
    assert jnp.allclose(jnp.sum(out_small, axis=-1), 1.0, atol=1e-5)
    assert jnp.allclose(out_small, ref_small, atol=1e-5, rtol=1e-5)

    # Batched case exercising the 2-step balanced grid (tb=152) and the ragged
    # last block (300 rows -> blocks of 152, last block partially OOB).
    x_big = jax.random.normal(k_x2, (300, state_dim), jnp.float32)
    out_big = jax.block_until_ready(actor_forward(x_big, params))
    ref_big = reference_forward(x_big, params)
    assert out_big.shape == (300, action_dim)
    assert jnp.allclose(jnp.sum(out_big, axis=-1), 1.0, atol=1e-5)
    assert jnp.allclose(out_big, ref_big, atol=1e-5, rtol=1e-5)

    print("KERNEL_OK")
</pallas_src>

<mosaic_0001>
module attributes {stable_mosaic.version = 11 : i64} {
  func.func @actor_kernel(%arg0: i32, %arg1: memref<8x4xf32, #tpu.memory_space<vmem>>, %arg2: memref<4x128xf32, #tpu.memory_space<vmem>>, %arg3: memref<1x128xf32, #tpu.memory_space<vmem>>, %arg4: memref<128x256xf32, #tpu.memory_space<vmem>>, %arg5: memref<1x256xf32, #tpu.memory_space<vmem>>, %arg6: memref<256x6xf32, #tpu.memory_space<vmem>>, %arg7: memref<1x6xf32, #tpu.memory_space<vmem>>, %arg8: memref<8x6xf32, #tpu.memory_space<vmem>>) attributes {dimension_semantics = [#tpu.dimension_semantics<parallel>], iteration_bounds = array<i64: 1>, scalar_prefetch = 0 : i64, scratch_operands = 0 : i64, tpu.core_type = #tpu.core_type<tc>, window_params = [{transform_indices = @transform_0, window_bounds = array<i64: 8, 4>}, {pipeline_mode = #tpu.pipeline_mode<synchronous>, transform_indices = @transform_1, window_bounds = array<i64: 4, 128>}, {pipeline_mode = #tpu.pipeline_mode<synchronous>, transform_indices = @transform_2, window_bounds = array<i64: 1, 128>}, {pipeline_mode = #tpu.pipeline_mode<synchronous>, transform_indices = @transform_3, window_bounds = array<i64: 128, 256>}, {pipeline_mode = #tpu.pipeline_mode<synchronous>, transform_indices = @transform_4, window_bounds = array<i64: 1, 256>}, {pipeline_mode = #tpu.pipeline_mode<synchronous>, transform_indices = @transform_5, window_bounds = array<i64: 256, 6>}, {pipeline_mode = #tpu.pipeline_mode<synchronous>, transform_indices = @transform_6, window_bounds = array<i64: 1, 6>}, {transform_indices = @transform_7, window_bounds = array<i64: 8, 6>}]} {
    %c0 = arith.constant 0 : index
    %c0_0 = arith.constant 0 : index
    %0 = vector.load %arg1[%c0, %c0_0] : memref<8x4xf32, #tpu.memory_space<vmem>>, vector<8x4xf32>
    %c0_1 = arith.constant 0 : index
    %c0_2 = arith.constant 0 : index
    %1 = vector.load %arg2[%c0_1, %c0_2] : memref<4x128xf32, #tpu.memory_space<vmem>>, vector<4x128xf32>
    %cst = arith.constant dense<0.000000e+00> : vector<8x128xf32>
    %2 = tpu.matmul %0, %1, %cst {dimension_numbers = #tpu.dot_dimension_numbers<[1], [0], [0], [1], [0, 0, 1, 1], [], []>} : vector<8x4xf32>, vector<4x128xf32>, vector<8x128xf32> -> vector<8x128xf32>
    %c0_3 = arith.constant 0 : index
    %c0_4 = arith.constant 0 : index
    %3 = vector.load %arg3[%c0_3, %c0_4] : memref<1x128xf32, #tpu.memory_space<vmem>>, vector<1x128xf32>
    %4 = vector.broadcast %3 : vector<1x128xf32> to vector<8x128xf32>
    %5 = arith.addf %2, %4 : vector<8x128xf32>
    %cst_5 = arith.constant 0.000000e+00 : f32
    %6 = vector.broadcast %cst_5 : f32 to vector<8x128xf32>
    %7 = arith.maximumf %5, %6 : vector<8x128xf32>
    %c0_6 = arith.constant 0 : index
    %c0_7 = arith.constant 0 : index
    %8 = vector.load %arg4[%c0_6, %c0_7] : memref<128x256xf32, #tpu.memory_space<vmem>>, vector<128x256xf32>
    %cst_8 = arith.constant dense<0.000000e+00> : vector<8x256xf32>
    %9 = tpu.matmul %7, %8, %cst_8 {dimension_numbers = #tpu.dot_dimension_numbers<[1], [0], [0], [1], [0, 0, 1, 1], [], []>} : vector<8x128xf32>, vector<128x256xf32>, vector<8x256xf32> -> vector<8x256xf32>
    %c0_9 = arith.constant 0 : index
    %c0_10 = arith.constant 0 : index
    %10 = vector.load %arg5[%c0_9, %c0_10] : memref<1x256xf32, #tpu.memory_space<vmem>>, vector<1x256xf32>
    %11 = vector.broadcast %10 : vector<1x256xf32> to vector<8x256xf32>
    %12 = arith.addf %9, %11 : vector<8x256xf32>
    %cst_11 = arith.constant 0.000000e+00 : f32
    %13 = vector.broadcast %cst_11 : f32 to vector<8x256xf32>
    %14 = arith.maximumf %12, %13 : vector<8x256xf32>
    %c0_12 = arith.constant 0 : index
    %c0_13 = arith.constant 0 : index
    %15 = vector.load %arg6[%c0_12, %c0_13] : memref<256x6xf32, #tpu.memory_space<vmem>>, vector<256x6xf32>
    %cst_14 = arith.constant dense<0.000000e+00> : vector<8x6xf32>
    %16 = tpu.matmul %14, %15, %cst_14 {dimension_numbers = #tpu.dot_dimension_numbers<[1], [0], [0], [1], [0, 0, 1, 1], [], []>} : vector<8x256xf32>, vector<256x6xf32>, vector<8x6xf32> -> vector<8x6xf32>
    %c0_15 = arith.constant 0 : index
    %c0_16 = arith.constant 0 : index
    %17 = vector.load %arg7[%c0_15, %c0_16] : memref<1x6xf32, #tpu.memory_space<vmem>>, vector<1x6xf32>
    %18 = vector.broadcast %17 : vector<1x6xf32> to vector<8x6xf32>
    %19 = arith.addf %16, %18 : vector<8x6xf32>
    %cst_17 = arith.constant dense<0xFF800000> : vector<8xf32>
    %20 = vector.multi_reduction <maximumf>, %19, %cst_17 [1] : vector<8x6xf32> to vector<8xf32>
    %21 = vector.shape_cast %20 : vector<8xf32> to vector<8x1xf32>
    %22 = vector.broadcast %21 : vector<8x1xf32> to vector<8x6xf32>
    %23 = arith.subf %19, %22 : vector<8x6xf32>
    %24 = math.exp %23 : vector<8x6xf32>
    %cst_18 = arith.constant dense<0.000000e+00> : vector<8xf32>
    %25 = vector.multi_reduction <add>, %24, %cst_18 [1] : vector<8x6xf32> to vector<8xf32>
    %26 = vector.shape_cast %25 : vector<8xf32> to vector<8x1xf32>
    %27 = tpu.reciprocal %26 : vector<8x1xf32> -> vector<8x1xf32>
    %28 = vector.broadcast %27 : vector<8x1xf32> to vector<8x6xf32>
    %29 = arith.mulf %24, %28 : vector<8x6xf32>
    %c0_19 = arith.constant 0 : index
    %c0_20 = arith.constant 0 : index
    %30 = vector.load %arg8[%c0_19, %c0_20] : memref<8x6xf32, #tpu.memory_space<vmem>>, vector<8x6xf32>
    tpu.vector_store %arg8[%c0_19, %c0_20], %29 {strides = array<i32>} : memref<8x6xf32, #tpu.memory_space<vmem>>, vector<8x6xf32>,
    return
  }
  func.func @transform_0(%arg0: i32) -> (i32, i32) {
    %c0_i32 = arith.constant 0 : i32
    %c0_i32_0 = arith.constant 0 : i32
    return %arg0, %c0_i32 : i32, i32
  }
  func.func @transform_1(%arg0: i32) -> (i32, i32) {
    %c0_i32 = arith.constant 0 : i32
    %c0_i32_0 = arith.constant 0 : i32
    %c0_i32_1 = arith.constant 0 : i32
    return %c0_i32, %c0_i32_0 : i32, i32
  }
  func.func @transform_2(%arg0: i32) -> (i32, i32) {
    %c0_i32 = arith.constant 0 : i32
    %c0_i32_0 = arith.constant 0 : i32
    %c0_i32_1 = arith.constant 0 : i32
    return %c0_i32, %c0_i32_0 : i32, i32
  }
  func.func @transform_3(%arg0: i32) -> (i32, i32) {
    %c0_i32 = arith.constant 0 : i32
    %c0_i32_0 = arith.constant 0 : i32
    %c0_i32_1 = arith.constant 0 : i32
    return %c0_i32, %c0_i32_0 : i32, i32
  }
  func.func @transform_4(%arg0: i32) -> (i32, i32) {
    %c0_i32 = arith.constant 0 : i32
    %c0_i32_0 = arith.constant 0 : i32
    %c0_i32_1 = arith.constant 0 : i32
    return %c0_i32, %c0_i32_0 : i32, i32
  }
  func.func @transform_5(%arg0: i32) -> (i32, i32) {
    %c0_i32 = arith.constant 0 : i32
    %c0_i32_0 = arith.constant 0 : i32
    %c0_i32_1 = arith.constant 0 : i32
    return %c0_i32, %c0_i32_0 : i32, i32
  }
  func.func @transform_6(%arg0: i32) -> (i32, i32) {
    %c0_i32 = arith.constant 0 : i32
    %c0_i32_0 = arith.constant 0 : i32
    %c0_i32_1 = arith.constant 0 : i32
    return %c0_i32, %c0_i32_0 : i32, i32
  }
  func.func @transform_7(%arg0: i32) -> (i32, i32) {
    %c0_i32 = arith.constant 0 : i32
    %c0_i32_0 = arith.constant 0 : i32
    return %arg0, %c0_i32 : i32, i32
  }
}

</mosaic_0001>

<bundles_post_ra>
// kernel: tpu_custom_call.1
= control target key start
LH: loop header
LB: loop body
LE: loop exit
PB: predicated region body
PF: predicated region fallthrough
CT: control target
= control target key end

     0   :  { %vm40_vm0 = vcmask 1043456   ;;  %v509_v2 = vmov 0.0   ;;  %vm510_vm1 = vmmov 0   ;;  %vm36_vm2 = vcmask 31744   ;;  %s774_s0 = inlined_call_operand.vmem [shape: f32[8,4], index: 0, kind: input, shape index: {}]   ;;  %s775_s1 = inlined_call_operand.vmem [shape: f32[4,128], index: 1, kind: input, shape index: {}]   ;;  %s776_s2 = inlined_call_operand.vmem [shape: f32[1,128], index: 2, kind: input, shape index: {}]   ;;  %s777_s3 = inlined_call_operand.vmem [shape: f32[128,256], index: 3, kind: input, shape index: {}]   ;;  %s778_s4 = inlined_call_operand.vmem [shape: f32[1,256], index: 4, kind: input, shape index: {}]   ;;  %s779_s5 = inlined_call_operand.vmem [shape: f32[256,6], index: 5, kind: input, shape index: {}]   ;;  %s780_s6 = inlined_call_operand.vmem [shape: f32[1,6], index: 6, kind: input, shape index: {}]   ;;  %s781_s7 = inlined_call_operand.hbm [shape: f32[8,6], index: 7, kind: output, shape index: {}]  }
   0x1   :  { %v28_v0 = vld [vmem:[%s775_s1] sm:$0xf]  ;;  %409 = vmatprep.subr.mxu0 %v509_v2  ;;  %411 = vmatprep.mubr.msk.f32.mxu0 %vm510_vm1, %v509_v2  ;;  %v116_v3 = vld [vmem:[%s777_s3 + $0x8] sm:$0xff]  ;;  %v118_v4 = vld [vmem:[%s777_s3 + $0x18] sm:$0xff] }
   0x2   :  { %v27_v1 = vld [vmem:[%s774_s0] sm:$0xff]  ;;  %410 = vmatpush3.msk.msra.mxu0 %vm40_vm0, %v28_v0  ;;  %v414_v6 = vpack.c.bf16 %v118_v4, %v116_v3  ;;  %v117_v7 = vld [vmem:[%s777_s3 + $0x10] sm:$0xff]  ;;  %v120_v8 = vld [vmem:[%s777_s3 + $0x28] sm:$0xff]  ;;  %223 = vmatprep.mubr.f32.mxu1 %v509_v2 }
   0x3   :  { %v115_v5 = vld [vmem:[%s777_s3] sm:$0xff]  ;;  %v122_v9 = vld [vmem:[%s777_s3 + $0x38] sm:$0xff]  ;;  %412 = vmatmul.mubr.msk.f32.vlgmr.msra.gmra.mrb[0].mxu0 %vm36_vm2, %v27_v1  ;;  %v121_v13 = vld [vmem:[%s777_s3 + $0x30] sm:$0xff] }
   0x4   :  { %v416_v10 = vpack.c.bf16 %v117_v7, %v115_v5  ;;  %v418_v11 = vpack.c.bf16 %v122_v9, %v120_v8  ;;  %v119_v12 = vld [vmem:[%s777_s3 + $0x20] sm:$0xff]  ;;  %v124_v14 = vld [vmem:[%s777_s3 + $0x48] sm:$0xff]  ;;  %415 = vmatprep.subr.bf16.mxu1 %v414_v6  ;;  %v126_v15 = vld [vmem:[%s777_s3 + $0x58] sm:$0xff] }
   0x5   :  { %v420_v16 = vpack.c.bf16 %v121_v13, %v119_v12  ;;  %v422_v17 = vpack.c.bf16 %v126_v15, %v124_v14  ;;  %v123_v18 = vld [vmem:[%s777_s3 + $0x40] sm:$0xff]  ;;  %v125_v19 = vld [vmem:[%s777_s3 + $0x50] sm:$0xff]  ;;  %v128_v20 = vld [vmem:[%s777_s3 + $0x68] sm:$0xff] }
   0x6   :  { %417 = vmatpush1.bf16.msra.mxu1 %v416_v10  ;;  %v130_v21 = vld [vmem:[%s777_s3 + $0x78] sm:$0xff]  ;;  %v424_v22 = vpack.c.bf16 %v125_v19, %v123_v18  ;;  %v127_v24 = vld [vmem:[%s777_s3 + $0x60] sm:$0xff]  ;;  %v129_v25 = vld [vmem:[%s777_s3 + $0x70] sm:$0xff] }
   0x7   :  { %419 = vmatprep.subr.bf16.mxu1 %v418_v11  ;;  %v426_v23 = vpack.c.bf16 %v130_v21, %v128_v20 }
   0xa   :  { %421 = vmatpush1.bf16.msra.mxu1 %v420_v16 }
   0xb   :  { %423 = vmatprep.subr.bf16.mxu1 %v422_v17 }
   0xc   :  { %12 = vsyncpa [#allocation3], 0  ;;  %v132_v26 = vld [vmem:[%s777_s3 + $0x88] sm:$0xff]  ;;  %v134_v27 = vld [vmem:[%s777_s3 + $0x98] sm:$0xff]  ;;  %v428_v28 = vpack.c.bf16 %v129_v25, %v127_v24  ;;  %vm341_vm3 = vcmask 48128  }
   0xd   :  { %v430_v29 = vpack.c.bf16 %v134_v27, %v132_v26  ;;  %v131_v30 = vld [vmem:[%s777_s3 + $0x80] sm:$0xff]  ;;  %v133_v31 = vld [vmem:[%s777_s3 + $0x90] sm:$0xff]  ;;  %v136_v32 = vld [vmem:[%s777_s3 + $0xa8] sm:$0xff] }
   0xe   :  { %425 = vmatpush1.bf16.msra.mxu1 %v424_v22  ;;  %v138_v33 = vld [vmem:[%s777_s3 + $0xb8] sm:$0xff]  ;;  %v432_v34 = vpack.c.bf16 %v133_v31, %v131_v30  ;;  %v135_v36 = vld [vmem:[%s777_s3 + $0xa0] sm:$0xff]  ;;  %v137_v37 = vld [vmem:[%s777_s3 + $0xb0] sm:$0xff] }
   0xf   :  { %427 = vmatprep.subr.bf16.mxu1 %v426_v23  ;;  %v434_v35 = vpack.c.bf16 %v138_v33, %v136_v32  ;;  %v140_v38 = vld [vmem:[%s777_s3 + $0xc8] sm:$0xff]  ;;  %v142_v39 = vld [vmem:[%s777_s3 + $0xd8] sm:$0xff]  ;;  %v436_v40 = vpack.c.bf16 %v137_v37, %v135_v36  ;;  %v139_v42 = vld [vmem:[%s777_s3 + $0xc0] sm:$0xff] }
  0x10   :  { %v438_v41 = vpack.c.bf16 %v142_v39, %v140_v38  ;;  %v141_v43 = vld [vmem:[%s777_s3 + $0xd0] sm:$0xff]  ;;  %v144_v45 = vld [vmem:[%s777_s3 + $0xe8] sm:$0xff]  ;;  %v146_v46 = vld [vmem:[%s777_s3 + $0xf8] sm:$0xff] }
  0x11   :  { %v440_v44 = vpack.c.bf16 %v141_v43, %v139_v42  ;;  %v442_v47 = vpack.c.bf16 %v146_v46, %v144_v45  ;;  %v143_v48 = vld [vmem:[%s777_s3 + $0xe0] sm:$0xff]  ;;  %v145_v49 = vld [vmem:[%s777_s3 + $0xf0] sm:$0xff]  ;;  %v249_v52 = vld [vmem:[%s779_s5 + $0x88] sm:$0xff] }
  0x12   :  { %429 = vmatpush1.bf16.msra.mxu1 %v428_v28  ;;  %v444_v50 = vpack.c.bf16 %v145_v49, %v143_v48  ;;  %v248_v51 = vld [vmem:[%s779_s5 + $0x80] sm:$0xff]  ;;  %v233_v55 = vld [vmem:[%s779_s5 + $0x8] sm:$0xff]  ;;  %v250_v56 = vld [vmem:[%s779_s5 + $0x90] sm:$0xff] }
  0x13   :  { %431 = vmatprep.subr.bf16.mxu1 %v430_v29  ;;  %v232_v53 = vld [vmem:[%s779_s5] sm:$0xff]  ;;  %v446_v54 = vpack.c.bf16 %v249_v52, %v248_v51  ;;  %v251_v57 = vld [vmem:[%s779_s5 + $0x98] sm:$0xff]  ;;  %v234_v60 = vld [vmem:[%s779_s5 + $0x10] sm:$0xff] }
  0x14   :  { %v448_v58 = vpack.c.bf16 %v233_v55, %v232_v53  ;;  %v450_v59 = vpack.c.bf16 %v251_v57, %v250_v56  ;;  %v235_v61 = vld [vmem:[%s779_s5 + $0x18] sm:$0xff]  ;;  %v252_v62 = vld [vmem:[%s779_s5 + $0xa0] sm:$0xff]  ;;  %v253_v63 = vld [vmem:[%s779_s5 + $0xa8] sm:$0xff] }
  0x15   :  { %447 = vmatprep.subr.bf16.mxu0 %v446_v54  ;;  %v452_v0 = vpack.c.bf16 %v235_v61, %v234_v60  ;;  %v454_v1 = vpack.c.bf16 %v253_v63, %v252_v62  ;;  %v236_v2 = vld [vmem:[%s779_s5 + $0x20] sm:$0xff]  ;;  %v237_v3 = vld [vmem:[%s779_s5 + $0x28] sm:$0xff]  ;;  %v254_v4 = vld [vmem:[%s779_s5 + $0xb0] sm:$0xff] }
  0x16   :  { %433 = vmatpush1.bf16.msra.mxu1 %v432_v34  ;;  %449 = vmatpush3.bf16.msra.mxu0 %v448_v58  ;;  %v255_v5 = vld [vmem:[%s779_s5 + $0xb8] sm:$0xff]  ;;  %v456_v6 = vpack.c.bf16 %v237_v3, %v236_v2  ;;  %v238_v8 = vld [vmem:[%s779_s5 + $0x30] sm:$0xff]  ;;  %v256_v10 = vld [vmem:[%s779_s5 + $0xc0] sm:$0xff] }
  0x17   :  { %435 = vmatprep.subr.bf16.mxu1 %v434_v35  ;;  %451 = vmatprep.subr.bf16.mxu0 %v450_v59  ;;  %v458_v7 = vpack.c.bf16 %v255_v5, %v254_v4  ;;  %v239_v9 = vld [vmem:[%s779_s5 + $0x38] sm:$0xff]  ;;  %v257_v11 = vld [vmem:[%s779_s5 + $0xc8] sm:$0xff]  ;;  %v240_v14 = vld [vmem:[%s779_s5 + $0x40] sm:$0xff] }
  0x18   :  { %v460_v12 = vpack.c.bf16 %v239_v9, %v238_v8  ;;  %v462_v13 = vpack.c.bf16 %v257_v11, %v256_v10  ;;  %v241_v15 = vld [vmem:[%s779_s5 + $0x48] sm:$0xff]  ;;  %v258_v16 = vld [vmem:[%s779_s5 + $0xd0] sm:$0xff]  ;;  %v259_v17 = vld [vmem:[%s779_s5 + $0xd8] sm:$0xff] }
  0x19   :  { %v464_v18 = vpack.c.bf16 %v241_v15, %v240_v14  ;;  %v466_v19 = vpack.c.bf16 %v259_v17, %v258_v16  ;;  %v242_v20 = vld [vmem:[%s779_s5 + $0x50] sm:$0xff]  ;;  %v243_v21 = vld [vmem:[%s779_s5 + $0x58] sm:$0xff]  ;;  %v260_v22 = vld [vmem:[%s779_s5 + $0xe0] sm:$0xff] }
  0x1a   :  { %437 = vmatpush1.bf16.msra.mxu1 %v436_v40  ;;  %453 = vmatpush3.bf16.msra.mxu0 %v452_v0  ;;  %v261_v23 = vld [vmem:[%s779_s5 + $0xe8] sm:$0xff]  ;;  %v468_v24 = vpack.c.bf16 %v243_v21, %v242_v20  ;;  %v368_v26 = vld [vmem:[%s776_s2] ss:$0 sm:$0xff]  ;;  %v262_v34 = vld [vmem:[%s779_s5 + $0xf0] sm:$0xff]  ;;  %v149_v40 = vlaneseq }
  0x1b   :  { %439 = vmatprep.subr.bf16.mxu1 %v438_v41  ;;  %455 = vmatprep.subr.bf16.mxu0 %v454_v1  ;;  %v470_v25 = vpack.c.bf16 %v261_v23, %v260_v22  ;;  %v244_v31 = vld [vmem:[%s779_s5 + $0x60] sm:$0xff]  ;;  %v245_v32 = vld [vmem:[%s779_s5 + $0x68] sm:$0xff]  ;;  %v263_v35 = vld [vmem:[%s779_s5 + $0xf8] sm:$0xff] }
  0x1c   :  { %v472_v33 = vpack.c.bf16 %v245_v32, %v244_v31  ;;  %v474_v36 = vpack.c.bf16 %v263_v35, %v262_v34  ;;  %v246_v37 = vld [vmem:[%s779_s5 + $0x70] sm:$0xff]  ;;  %v247_v38 = vld [vmem:[%s779_s5 + $0x78] sm:$0xff]  ;;  %v150_v41 = vshrl.u32 %v149_v40, 7  ;;  %v147_v43 = vld [vmem:[%s778_s4] sm:$0x3]  ;;  %s511_s4 = smov [#allocation2]  }
  0x1d   :  { %v476_v39 = vpack.c.bf16 %v247_v38, %v246_v37  ;;  %v371_v55 = vld [vmem:[%s780_s6] ss:$0 sm:$0xff]  ;;  %s360_s9 = sshll.u32 %s511_s4, 4  ;;  %s361_s9 = int_to_ptr.vmem [resolvable:$true] %s360_s9 }
  0x1e   :  { %441 = vmatpush1.bf16.msra.mxu1 %v440_v44  ;;  %457 = vmatpush3.bf16.msra.mxu0 %v456_v6  ;;  %v151_v42 = vsub.s32 0, %v150_v41  ;;  %v155_v44 = vsub.s32 1, %v150_v41  ;;  %s485_s6 = scalar_lea.vmem %s361_s9, 128  ;;  %p490_p1 = scmp.lt.s32.totalorder %s361_s9, %s361_s9 }
  0x1f   :  { %443 = vmatprep.subr.bf16.mxu1 %v442_v47  ;;  %459 = vmatprep.subr.bf16.mxu0 %v458_v7  ;;  %p486_p0 = scmp.ne.s32.totalorder %s361_s9, %s485_s6  ;;  %p491_p2 = scmp.lt.s32.totalorder %s485_s6, %s485_s6 }
  0x20   :  { %v152_v45 = vrot.slane %v147_v43, %v151_v42  ;;  %v156_v46 = vrot.slane %v147_v43, %v155_v44 }
  0x21   :  { %p492_p3 = por %p491_p2, %p490_p1 }
  0x22   :  { %445 = vmatpush1.bf16.msra.mxu1 %v444_v50  ;;  %461 = vmatpush3.bf16.msra.mxu0 %v460_v12 }
  0x23   :  { %463 = vmatprep.subr.bf16.mxu0 %v462_v13  ;;  %p493_p4 = pnand %p492_p3, %p486_p0 }
  0x26   :  { %465 = vmatpush3.bf16.msra.mxu0 %v464_v18 }
  0x27   :  { %467 = vmatprep.subr.bf16.mxu0 %v466_v19 }
  0x2a   :  { %469 = vmatpush3.bf16.msra.mxu0 %v468_v24 }
  0x2b   :  { %471 = vmatprep.subr.bf16.mxu0 %v470_v25 }
  0x2e   :  { %473 = vmatpush3.bf16.msra.mxu0 %v472_v33 }
  0x2f   :  { %475 = vmatprep.subr.bf16.mxu0 %v474_v36 }
  0x32   :  { %477 = vmatpush3.bf16.msra.mxu0 %v476_v39 }
  0xd6   :  { %v110_v27 = vpop.f32.mrb[0].mxu0 }
  0xd7   :  { %v111_v28 = vadd.f32 %v368_v26, %v110_v27  ;;  %v413_v29 = vpop.f32.mrb[1].mxu0 }
  0xd9   :  { %v114_v30 = vmax.f32 %v111_v28, 0.0 }
  0xdb   :  { %224 = vmatmul.mubr.f32.vlgmr.msra.gmra.mrb[0].mxu1 %v114_v30 }
 0x1ae   :  { %v225_v47 = vpop.f32.mrb[0].mxu1 }
 0x1af   :  { %v226_v48 = vadd.f32 %v225_v47, %v152_v45  ;;  %v227_v49 = vpop.f32.mrb[1].mxu1 }
 0x1b0   :  { %v228_v50 = vadd.f32 %v227_v49, %v156_v46 }
 0x1b1   :  { %v230_v52 = vmax.f32 %v226_v48, 0.0 }
 0x1b2   :  { %v231_v51 = vmax.f32 %v228_v50, 0.0 }
 0x1b4   :  { %335 = vmatprep.mubr.f32.mxu0 %v231_v51 }
 0x1b5   :  { %336 = vmatmul.mubr.f32.vlgmr.msra.gmra.mrb[2].mxu0 %v230_v52 }
 0x288   :  { %v406_v53 = vpop.f32.mrb[2].mxu0 }
 0x289   :  { %v407_v54 = vpop.f32.mrb[3].mxu0 }
 0x28a   :  { %v408_v56 = vadd.f32 %v407_v54, %v406_v53 }
 0x28c   :  { %v338_v57 = vadd.f32 %v408_v56, %v371_v55 }
 0x28e   :  { %v342_v58 = vsel %vm341_vm3, %v338_v57, -inf }
 0x28f   :  { %343 = vmax.xlane.f32.xlu0 %v342_v58 }
 0x31c   :  { %v344_v59 = vpop.xlane.xlu0 %343 }
 0x31d   :  { %v345_v60 = vsub.f32 %v338_v57, %v344_v59 }
 0x31f   :  { %v346_v61 = vmul.f32 1.442695, %v345_v60 }
 0x321   :  { %481 = vpow2.f32 %v346_v61 }
 0x32b   :  { %v482_v62 = vpop.eup %481 }
 0x32c   :  { %v348_v63 = vsel %vm341_vm3, %v482_v62, 0.0 }
 0x32d   :  { %349 = vadd.xlane.f32.xlu0 %v348_v63 }
 0x3ba   :  { %v350_v0 = vpop.xlane.xlu0 %349 }
 0x3bb   :  { %483 = vrcp.f32 %v350_v0 }
 0x3c5   :  { %v484_v1 = vpop.eup %483 }
 0x3c6   :  { %v352_v2 = vmul.f32 %v484_v1, %v482_v62 }
 0x3c8   :  { %353 = vst.msk [vmem:[#allocation2] sm:$0xff] %vm341_vm3, %v352_v2 }
 0x3c9   :  { %496 = shalt.err (!%p493_p4)
}
 0x3ca   :  { %s497_s10 = scalar_lea.hbm %s781_s7, 128 }
 0x3cb   :  { %p498_p5 = scmp.ne.s32.totalorder %s781_s7, %s497_s10  ;;  %p501_p6 = scmp.lt.u32.totalorder %s497_s10, %s781_s7 }
 0x3cd   :  { %p503_p7 = pnand %p501_p6, %p498_p5 }
 0x3cf   :  { %506 = shalt.err (!%p503_p7)
}
 0x3d0   :  { %363 = dma.vmem_to_hbm [thread:$0]  %s361_s9, 128, %s781_s7, [#allocation3]  }
 0x3d1   :  { %507 = dma.done.wait [#allocation3], 128  }
 0x3d2   :  { %508 = vsyncadd [#allocation3], 4294967168 }
 0x3d3   :  { %367 = vsyncpa [#allocation3], 1 }

</bundles_post_ra>
